<compile_context>
chip_gen: v6e
topology: v6e:2x2x1
jax: 0.10.0
libtpu: 0.0.40
codegen_flags: <defaults>
</compile_context>

<pallas_src>
import jax
import jax.numpy as jnp
from jax.experimental import pallas as pl
from jax.experimental.pallas import tpu as pltpu


# ----------------------------------------------------------------------------
# Pallas kernel: one bf16 MXU matmul (f32 accumulation) + f32 bias + store.
# ----------------------------------------------------------------------------
def e2sx3d_fused_kernel(
    feat_ref,   # [TB, K]  bf16  concat([flow_feat, rgb_feat], -1) tile
    w_ref,      # [K, Cp]  bf16  K-stacked folded weight (resident across grid)
    b_ref,      # [1, Cp]  f32   folded bias (resident across grid)
    out_ref,    # [TB, Cp] f32
):
    acc = jnp.dot(feat_ref[...], w_ref[...], preferred_element_type=jnp.float32)
    out_ref[...] = (acc + b_ref[...]).astype(out_ref.dtype)


def _round_up(x, m):
    return ((x + m - 1) // m) * m


# ----------------------------------------------------------------------------
# One-time parameter preparation (fold + stack + pad + cast). Runs at init,
# never per call.
# ----------------------------------------------------------------------------
def fuse_e2sx3d_params(wf, bf, wr, br, wh, bh):
    """wf/wr: [C, F] stream proj weights (PyTorch [out,in]); wh: [C, 2C]; biases [C]."""
    C = wh.shape[0]
    wh_t = wh.T.astype(jnp.float32)                      # [2C, C]
    wh_top, wh_bot = wh_t[:C], wh_t[C:]                  # flow half, rgb half
    # forward does cat([flowstream(flows), rgbstream(rgbs)]) -> flow first.
    w1 = wf.T.astype(jnp.float32) @ wh_top               # [Ff, C]
    w2 = wr.T.astype(jnp.float32) @ wh_bot               # [Fr, C]
    w = jnp.concatenate([w1, w2], axis=0)                # [Ff+Fr, C] K-stacked
    b_fused = (bf.astype(jnp.float32) @ wh_top
               + br.astype(jnp.float32) @ wh_bot
               + bh.astype(jnp.float32))                 # [C]

    cp = _round_up(max(C, 128), 128)                     # lane-dense output
    pad = cp - C
    wp = jnp.pad(w, ((0, 0), (0, pad))).astype(jnp.bfloat16)         # [K, Cp]
    bp = jnp.pad(b_fused, (0, pad)).reshape(1, cp).astype(jnp.float32)
    return wp, bp


# ----------------------------------------------------------------------------
# Per-call wrapper: one K-concat of the two bf16 feature streams, then a
# batch-gridded pallas_call with resident weights and pipelined feature tiles.
# ----------------------------------------------------------------------------
def e2sx3d_head(flow_feat, rgb_feat, fused_params, num_classes, *, tb=512):
    wp, bp = fused_params
    K, Cp = wp.shape
    B = flow_feat.shape[0]

    # Single [B, Ff+Fr] bf16 feature slab feeding one K-stacked matmul.
    feats = jnp.concatenate([flow_feat, rgb_feat], axis=1)

    if B <= tb:
        TB = B          # full-extent block: exempt from the (8,128) rule
    else:
        TB = tb         # multiple of 8; trailing partial block is masked
    grid = (pl.cdiv(B, TB),)

    flops = 2 * B * K * Cp
    bytes_accessed = feats.size * 2 + wp.size * 2 + bp.size * 4 + B * Cp * 4

    out_padded = pl.pallas_call(
        e2sx3d_fused_kernel,
        out_shape=jax.ShapeDtypeStruct((B, Cp), jnp.float32),
        grid=grid,
        in_specs=[
            pl.BlockSpec((TB, K), lambda i: (i, 0)),    # feature tiles (pipelined)
            pl.BlockSpec((K, Cp), lambda i: (0, 0)),    # weight resident
            pl.BlockSpec((1, Cp), lambda i: (0, 0)),    # bias resident
        ],
        out_specs=pl.BlockSpec((TB, Cp), lambda i: (i, 0)),
        compiler_params=pltpu.CompilerParams(
            # Batch axis is independent -> shards across both v7x TensorCores.
            dimension_semantics=("parallel",),
        ),
        cost_estimate=pl.CostEstimate(
            flops=flops, transcendentals=0, bytes_accessed=bytes_accessed),
    )(feats, wp, bp)

    # Padded lanes carry bias garbage; slice before any downstream reduction.
    return out_padded[:, :num_classes]


# ----------------------------------------------------------------------------
# Deterministic stand-in for the pretrained X3D trunks (plain-JAX glue).
# Emits bf16 features directly so the head wrapper does no per-call casts.
# TODO(synk): the torch.hub pretrained X3D backbone trunks have no Pallas
#             equivalent here; replaced by GAP + fixed linear stem. At real
#             sizes, fuse this head into the feature-producing kernel so the
#             [B, F] features never round-trip HBM.
# ----------------------------------------------------------------------------
def backbone_features(video_ncthw, stem_w):
    # video: [B, 3, T, H, W] -> GAP over (T, H, W) -> [B, 3] -> [B, in_features]
    pooled = jnp.mean(video_ncthw, axis=(2, 3, 4))
    return (pooled @ stem_w).astype(jnp.bfloat16)


def linear_init(key, out_f, in_f):
    """Deterministic nn.Linear-style init: U(-1/sqrt(in), 1/sqrt(in))."""
    kw, kb = jax.random.split(key)
    bound = 1.0 / jnp.sqrt(jnp.float32(in_f))
    w = jax.random.uniform(kw, (out_f, in_f), jnp.float32, -bound, bound)
    b = jax.random.uniform(kb, (out_f,), jnp.float32, -bound, bound)
    return w, b


if __name__ == "__main__":
    # Small, module-consistent shapes.
    B, T, H, W = 2, 8, 16, 16          # video clips [B, 3, T, H, W]
    IN_FEATURES = 256                  # backbone proj.in_features (small stand-in)
    NUM_CLASSES = 32

    root = jax.random.PRNGKey(0)
    k_rgb, k_flow, k_stem_r, k_stem_f, k_wf, k_wr, k_wh = jax.random.split(root, 7)

    rgbs = jax.random.normal(k_rgb, (B, 3, T, H, W), jnp.float32)
    flows = jax.random.normal(k_flow, (B, 3, T, H, W), jnp.float32)

    # Stand-in backbone stems (deterministic, frozen).
    stem_rgb = jax.random.normal(k_stem_r, (3, IN_FEATURES), jnp.float32) * 0.1
    stem_flow = jax.random.normal(k_stem_f, (3, IN_FEATURES), jnp.float32) * 0.1

    # Module-owned parameters (shapes exactly as in E2SX3D.__init__).
    wf, bf = linear_init(k_wf, NUM_CLASSES, IN_FEATURES)        # flowstream proj
    wr, br = linear_init(k_wr, NUM_CLASSES, IN_FEATURES)        # rgbstream proj
    wh, bh = linear_init(k_wh, NUM_CLASSES, 2 * NUM_CLASSES)    # head

    # One-time fold/stack/pad/cast of the module parameters.
    fused_params = fuse_e2sx3d_params(wf, bf, wr, br, wh, bh)
    fused_params = jax.tree_util.tree_map(jax.block_until_ready, fused_params)

    flow_feat = backbone_features(flows, stem_flow)   # [B, IN_FEATURES] bf16
    rgb_feat = backbone_features(rgbs, stem_rgb)      # [B, IN_FEATURES] bf16

    out = e2sx3d_head(flow_feat, rgb_feat, fused_params, NUM_CLASSES)
    out = jax.block_until_ready(out)

    # Reference (plain JAX, f32, original 3-matmul structure) on the same features.
    ff32 = flow_feat.astype(jnp.float32)
    rf32 = rgb_feat.astype(jnp.float32)
    fs_ref = ff32 @ wf.T + bf
    aps_ref = rf32 @ wr.T + br
    ref = jnp.concatenate([fs_ref, aps_ref], axis=1) @ wh.T + bh
    assert out.shape == (B, NUM_CLASSES)
    assert jnp.allclose(out, ref, atol=2e-3, rtol=2e-2), (
        float(jnp.max(jnp.abs(out - ref))))

    print("KERNEL_OK")
</pallas_src>

<mosaic_0001>
module attributes {stable_mosaic.version = 11 : i64} {
  func.func @e2sx3d_fused_kernel(%arg0: i32, %arg1: memref<2x512xbf16, #tpu.memory_space<vmem>>, %arg2: memref<512x128xbf16, #tpu.memory_space<vmem>>, %arg3: memref<1x128xf32, #tpu.memory_space<vmem>>, %arg4: memref<2x128xf32, #tpu.memory_space<vmem>>) attributes {dimension_semantics = [#tpu.dimension_semantics<parallel>], iteration_bounds = array<i64: 1>, scalar_prefetch = 0 : i64, scratch_operands = 0 : i64, tpu.core_type = #tpu.core_type<tc>, window_params = [{transform_indices = @transform_0, window_bounds = array<i64: 2, 512>}, {pipeline_mode = #tpu.pipeline_mode<synchronous>, transform_indices = @transform_1, window_bounds = array<i64: 512, 128>}, {pipeline_mode = #tpu.pipeline_mode<synchronous>, transform_indices = @transform_2, window_bounds = array<i64: 1, 128>}, {transform_indices = @transform_3, window_bounds = array<i64: 2, 128>}]} {
    %c0 = arith.constant 0 : index
    %c0_0 = arith.constant 0 : index
    %0 = vector.load %arg1[%c0, %c0_0] : memref<2x512xbf16, #tpu.memory_space<vmem>>, vector<2x512xbf16>
    %c0_1 = arith.constant 0 : index
    %c0_2 = arith.constant 0 : index
    %1 = vector.load %arg2[%c0_1, %c0_2] : memref<512x128xbf16, #tpu.memory_space<vmem>>, vector<512x128xbf16>
    %cst = arith.constant dense<0.000000e+00> : vector<2x128xf32>
    %2 = tpu.matmul %0, %1, %cst {dimension_numbers = #tpu.dot_dimension_numbers<[1], [0], [0], [1], [0, 0, 1, 1], [], []>} : vector<2x512xbf16>, vector<512x128xbf16>, vector<2x128xf32> -> vector<2x128xf32>
    %c0_3 = arith.constant 0 : index
    %c0_4 = arith.constant 0 : index
    %3 = vector.load %arg3[%c0_3, %c0_4] : memref<1x128xf32, #tpu.memory_space<vmem>>, vector<1x128xf32>
    %4 = vector.broadcast %3 : vector<1x128xf32> to vector<2x128xf32>
    %5 = arith.addf %2, %4 : vector<2x128xf32>
    %c0_5 = arith.constant 0 : index
    %c0_6 = arith.constant 0 : index
    %6 = vector.load %arg4[%c0_5, %c0_6] : memref<2x128xf32, #tpu.memory_space<vmem>>, vector<2x128xf32>
    tpu.vector_store %arg4[%c0_5, %c0_6], %5 {strides = array<i32>} : memref<2x128xf32, #tpu.memory_space<vmem>>, vector<2x128xf32>,
    return
  }
  func.func @transform_0(%arg0: i32) -> (i32, i32) {
    %c0_i32 = arith.constant 0 : i32
    %c0_i32_0 = arith.constant 0 : i32
    return %arg0, %c0_i32 : i32, i32
  }
  func.func @transform_1(%arg0: i32) -> (i32, i32) {
    %c0_i32 = arith.constant 0 : i32
    %c0_i32_0 = arith.constant 0 : i32
    %c0_i32_1 = arith.constant 0 : i32
    return %c0_i32, %c0_i32_0 : i32, i32
  }
  func.func @transform_2(%arg0: i32) -> (i32, i32) {
    %c0_i32 = arith.constant 0 : i32
    %c0_i32_0 = arith.constant 0 : i32
    %c0_i32_1 = arith.constant 0 : i32
    return %c0_i32, %c0_i32_0 : i32, i32
  }
  func.func @transform_3(%arg0: i32) -> (i32, i32) {
    %c0_i32 = arith.constant 0 : i32
    %c0_i32_0 = arith.constant 0 : i32
    return %arg0, %c0_i32 : i32, i32
  }
}

</mosaic_0001>

<bundles_post_ra>
// kernel: tpu_custom_call.1
= control target key start
LH: loop header
LB: loop body
LE: loop exit
PB: predicated region body
PF: predicated region fallthrough
CT: control target
= control target key end

     0   :  { %8 = vsyncpa [#allocation3], 0  ;;  %s652_s0 = inlined_call_operand.hbm [shape: bf16[2,512], index: 0, kind: input, shape index: {}]   ;;  %s653_s1 = inlined_call_operand.hbm [shape: bf16[512,128], index: 1, kind: input, shape index: {}]   ;;  %s654_s2 = inlined_call_operand.vmem [shape: f32[1,128], index: 2, kind: input, shape index: {}]   ;;  %s655_s3 = inlined_call_operand.hbm [shape: f32[2,128], index: 3, kind: output, shape index: {}]  }
   0x1   :  { %9 = vsyncpa [#allocation6], 0 }
   0x2   :  { %10 = vsyncpa [#allocation4], 0  ;;  %s614_s12 = smov [#allocation2]   ;;  %s615_s14 = smov [#allocation5]  }
   0x3   :  { %s17_s13 = sshll.u32 %s614_s12, 4  ;;  %s26_s15 = sshll.u32 %s615_s14, 4  ;;  %s18_s13 = int_to_ptr.vmem [resolvable:$true] %s17_s13  ;;  %s27_s15 = int_to_ptr.vmem [resolvable:$true] %s26_s15 }
   0x4   :  { %s556_s16 = scalar_lea.vmem %s18_s13, 64  ;;  %p561_p1 = scmp.lt.s32.totalorder %s18_s13, %s18_s13 }
   0x5   :  { %p557_p0 = scmp.ne.s32.totalorder %s18_s13, %s556_s16  ;;  %p562_p2 = scmp.lt.s32.totalorder %s556_s16, %s556_s16 }
   0x7   :  { %p563_p3 = por %p562_p2, %p561_p1 }
   0x9   :  { %p564_p4 = pnand %p563_p3, %p557_p0 }
   0xb   :  { %567 = shalt.err (!%p564_p4)
}
   0xc   :  { %20 = dma.hbm_to_vmem [thread:$0]  %s652_s0, 64, %s18_s13, [#allocation3]  }
   0xd   :  { %s576_s19 = scalar_lea.vmem %s27_s15, 4096  ;;  %p581_p6 = scmp.lt.s32.totalorder %s27_s15, %s27_s15 }
   0xe   :  { %p577_p5 = scmp.ne.s32.totalorder %s27_s15, %s576_s19  ;;  %p582_p7 = scmp.lt.s32.totalorder %s576_s19, %s576_s19 }
  0x10   :  { %p583_p8 = por %p582_p7, %p581_p6 }
  0x12   :  { %p584_p9 = pnand %p583_p8, %p577_p5 }
  0x14   :  { %587 = shalt.err (!%p584_p9)
}
  0x15   :  { %s616_s20 = smov 64   ;;  %s617_s21 = smov 4  }
  0x16   :  { %32 = dma.hbm_to_vmem [thread:$0]  %s653_s1, 4096, %s27_s15, [#allocation6], %s616_s20, %s616_s20, %s617_s21  }
  0x17   :  { %608 = dma.done.wait [#allocation3], 64  }
  0x18   :  { %609 = vsyncadd [#allocation3], 4294967232 }
  0x19   :  { %610 = dma.done.wait [#allocation6], 4096  }
  0x1a   :  { %611 = vsyncadd [#allocation6], 4294963200  ;;  %v516_v0 = vld [vmem:[#allocation5 + $0x78] sm:$0xff]   ;;  %v520_v4 = vld [vmem:[#allocation5 + $0x70] sm:$0xff]   ;;  %v618_v22 = vmov 1966171168   ;;  %v126_v24 = vlaneseq }
  0x1b   :  { %v517_v1 = vld [vmem:[#allocation5 + $0xf8] sm:$0xff]   ;;  %466 = vmatprep.subr.bf16.mxu0 %v516_v0  ;;  %v521_v5 = vld [vmem:[#allocation5 + $0xf0] sm:$0xff]   ;;  %v524_v8 = vld [vmem:[#allocation5 + $0x68] sm:$0xff]   ;;  %v124_v23 = vunpack.c.l.s4 %v618_v22  ;;  %s619_s24 = smov [#allocation7]  }
  0x1c   :  { %v518_v2 = vld [vmem:[#allocation5 + $0x38] sm:$0xff]   ;;  %488 = vmatprep.subr.bf16.mxu1 %v517_v1  ;;  %v522_v6 = vld [vmem:[#allocation5 + $0x30] sm:$0xff]   ;;  %v525_v9 = vld [vmem:[#allocation5 + $0xe8] sm:$0xff]   ;;  %v127_v30 = vshrl.u32 %v126_v24, 7  ;;  %s422_s25 = sshll.u32 %s619_s24, 4  ;;  %s423_s25 = int_to_ptr.vmem [resolvable:$true] %s422_s25 }
  0x1d   :  { %v519_v3 = vld [vmem:[#allocation5 + $0xb8] sm:$0xff]   ;;  %467 = vmatpush3.bf16.msra.mxu0 %v518_v2  ;;  %v523_v7 = vld [vmem:[#allocation5 + $0xb0] sm:$0xff]   ;;  %v526_v10 = vld [vmem:[#allocation5 + $0x28] sm:$0xff]   ;;  %v125_v29 = vunpack.c.0.s8 %v124_v23  ;;  %s588_s26 = scalar_lea.vmem %s423_s25, 32  ;;  %p593_p11 = scmp.lt.s32.totalorder %s423_s25, %s423_s25 }
  0x1e   :  { %489 = vmatpush3.bf16.msra.mxu1 %v519_v3  ;;  %468 = vmatprep.subr.bf16.mxu0 %v520_v4  ;;  %v527_v11 = vld [vmem:[#allocation5 + $0xa8] sm:$0xff]   ;;  %v528_v12 = vld [vmem:[#allocation5 + $0x60] sm:$0xff]   ;;  %v532_v16 = vld [vmem:[#allocation5 + $0x58] sm:$0xff]   ;;  %p589_p10 = scmp.ne.s32.totalorder %s423_s25, %s588_s26  ;;  %p594_p12 = scmp.lt.s32.totalorder %s588_s26, %s588_s26 }
  0x1f   :  { %490 = vmatprep.subr.bf16.mxu1 %v521_v5  ;;  %v529_v13 = vld [vmem:[#allocation5 + $0xe0] sm:$0xff]   ;;  %v533_v17 = vld [vmem:[#allocation5 + $0xd8] sm:$0xff]   ;;  %v536_v20 = vld [vmem:[#allocation5 + $0x50] sm:$0xff]   ;;  %v128_v35 = vsub.s32 %v125_v29, %v127_v30 }
  0x20   :  { %v530_v14 = vld [vmem:[#allocation5 + $0x20] sm:$0xff]   ;;  %v534_v18 = vld [vmem:[#allocation5 + $0x18] sm:$0xff]   ;;  %v537_v21 = vld [vmem:[#allocation5 + $0xd0] sm:$0xff]   ;;  %p595_p13 = por %p594_p12, %p593_p11 }
  0x21   :  { %469 = vmatpush3.bf16.msra.mxu0 %v522_v6  ;;  %v531_v15 = vld [vmem:[#allocation5 + $0xa0] sm:$0xff]   ;;  %v535_v19 = vld [vmem:[#allocation5 + $0x98] sm:$0xff]   ;;  %v538_v25 = vld [vmem:[#allocation5 + $0x10] sm:$0xff]  }
  0x22   :  { %491 = vmatpush3.bf16.msra.mxu1 %v523_v7  ;;  %470 = vmatprep.subr.bf16.mxu0 %v524_v8  ;;  %v539_v26 = vld [vmem:[#allocation5 + $0x90] sm:$0xff]   ;;  %v540_v27 = vld [vmem:[#allocation5 + $0x48] sm:$0xff]   ;;  %v544_v33 = vld [vmem:[#allocation5 + $0x40] sm:$0xff]   ;;  %p596_p0 = pnand %p595_p13, %p589_p10 }
  0x23   :  { %492 = vmatprep.subr.bf16.mxu1 %v525_v9  ;;  %v541_v28 = vld [vmem:[#allocation5 + $0xc8] sm:$0xff]   ;;  %v545_v34 = vld [vmem:[#allocation5 + $0xc0] sm:$0xff]   ;;  %v433_v38 = vld.sshfl [vmem:[#allocation2] sm:$0x33 pattern:$0x75316420] }
  0x24   :  { %v542_v31 = vld [vmem:[#allocation5 + $0x8] sm:$0xff]   ;;  %v546_v36 = vld [vmem:[#allocation5] sm:$0xff]   ;;  %v122_v39 = vcombine.high %v433_v38, %v433_v38  ;;  %v129_v40 = vrot.slane %v433_v38, %v128_v35  ;;  %v432_v46 = vld [vmem:[%s654_s2] ss:$0 sm:$0xff] }
  0x25   :  { %471 = vmatpush3.bf16.msra.mxu0 %v526_v10  ;;  %v543_v32 = vld [vmem:[#allocation5 + $0x88] sm:$0xff]   ;;  %v547_v37 = vld [vmem:[#allocation5 + $0x80] sm:$0xff]  }
  0x26   :  { %493 = vmatpush3.bf16.msra.mxu1 %v527_v11  ;;  %472 = vmatprep.subr.bf16.mxu0 %v528_v12  ;;  %v136_v41 = vrot.slane %v122_v39, %v128_v35  ;;  %v137_v42 = vcombine.high %v129_v40, %v129_v40 }
  0x27   :  { %494 = vmatprep.subr.bf16.mxu1 %v529_v13 }
  0x28   :  { %367 = vmatprep.mubr.bf16.mxu0 %v136_v41  ;;  %v138_v43 = vcombine.high %v136_v41, %v136_v41 }
  0x29   :  { %473 = vmatpush3.bf16.msra.mxu0 %v530_v14 }
  0x2a   :  { %495 = vmatpush3.bf16.msra.mxu1 %v531_v15  ;;  %474 = vmatprep.subr.bf16.mxu0 %v532_v16 }
  0x2b   :  { %496 = vmatprep.subr.bf16.mxu1 %v533_v17  ;;  %407 = vmatprep.mubr.bf16.mxu1 %v138_v43 }
  0x2d   :  { %475 = vmatpush3.bf16.msra.mxu0 %v534_v18 }
  0x2e   :  { %497 = vmatpush3.bf16.msra.mxu1 %v535_v19  ;;  %476 = vmatprep.subr.bf16.mxu0 %v536_v20 }
  0x2f   :  { %498 = vmatprep.subr.bf16.mxu1 %v537_v21 }
  0x31   :  { %477 = vmatpush3.bf16.msra.mxu0 %v538_v25 }
  0x32   :  { %499 = vmatpush3.bf16.msra.mxu1 %v539_v26  ;;  %478 = vmatprep.subr.bf16.mxu0 %v540_v27 }
  0x33   :  { %500 = vmatprep.subr.bf16.mxu1 %v541_v28 }
  0x35   :  { %479 = vmatpush3.bf16.msra.mxu0 %v542_v31 }
  0x36   :  { %501 = vmatpush3.bf16.msra.mxu1 %v543_v32  ;;  %480 = vmatprep.subr.bf16.mxu0 %v544_v33 }
  0x37   :  { %502 = vmatprep.subr.bf16.mxu1 %v545_v34 }
  0x39   :  { %481 = vmatpush3.bf16.msra.mxu0 %v546_v36 }
  0x3a   :  { %503 = vmatpush3.bf16.msra.mxu1 %v547_v37 }
  0x3c   :  { %368 = vmatmul.mubr.bf16.vlgmr.msra.gmra.mxu0 %v129_v40 }
  0x3d   :  { %408 = vmatmul.mubr.bf16.vlgmr.msra.gmra.mxu1 %v137_v42 }
  0xfc   :  { %v482_v44 = vpop.f32.mrf.mxu0 }
  0xfd   :  { %v504_v45 = vpop.f32.mrf.mxu1 }
  0xfe   :  { %v483_v47 = vpop.f32.mrf.mxu0 }
  0xff   :  { %v484_v48 = vadd.f32 %v483_v47, %v482_v44  ;;  %v505_v49 = vpop.f32.mrf.mxu1 }
 0x100   :  { %v485_v50 = vpop.f32.mrf.mxu0  ;;  %v506_v52 = vadd.f32 %v505_v49, %v504_v45 }
 0x101   :  { %v370_v51 = vadd.f32 %v484_v48, %v432_v46  ;;  %v507_v53 = vpop.f32.mrf.mxu1 }
 0x102   :  { %v486_v54 = vpop.f32.mrf.mxu0 }
 0x103   :  { %v410_v55 = vadd.f32 %v506_v52, %v370_v51  ;;  %v508_v56 = vpop.f32.mrf.mxu1 }
 0x105   :  { %415 = vst [vmem:[#allocation7] sm:$0x3] %v410_v55 }
 0x106   :  { %599 = shalt.err (!%p596_p0)
}
 0x107   :  { %425 = dma.vmem_to_hbm [thread:$0]  %s423_s25, 32, %s655_s3, [#allocation4]  }
 0x108   :  { %612 = dma.done.wait [#allocation4], 32  }
 0x109   :  { %613 = vsyncadd [#allocation4], 4294967264 }
 0x10a   :  { %429 = vsyncpa [#allocation3], 1 }
 0x10b   :  { %430 = vsyncpa [#allocation6], 1 }
 0x10c   :  { %431 = vsyncpa [#allocation4], 1 }

</bundles_post_ra>
